<compile_context>
chip_gen: v7x
topology: tpu7x:2x2x1
jax: 0.10.0
libtpu: 0.0.40
codegen_flags: <defaults>
</compile_context>

<pallas_src>
import jax
import jax.numpy as jnp
from jax.experimental import pallas as pl
from jax.experimental.pallas import tpu as pltpu


def _bbn_kernel(x_ref, w_ref, bias_ref, out_ref):
    # x_ref:    [G, B, D]     G independent instances per grid step
    # w_ref:    [D + Cp, 2Cp] rows 0..D-1 = fc1|nsb1 (padded), rows D.. = fc2|nsb2
    # bias_ref: [4, 2Cp]      row0 = b1|bn1, row1 = b2|bn2, row2 = fc3 w, row3 = fc3 b
    # out_ref:  [G, B, 1]
    G, B, D = x_ref.shape
    Cp = w_ref.shape[1] // 2          # padded per-branch width (128)

    w1 = w_ref[:D, :]                 # [D, 2Cp]   fc1 | nsb1  (zero-padded cols)
    w2 = w_ref[D:, :]                 # [Cp, 2Cp]  fc2 | nsb2  (zero-padded rows/cols)
    ba = bias_ref[0:1, :]             # [1, 2Cp]
    bb = bias_ref[1:2, :]             # [1, 2Cp]
    w3 = bias_ref[2:3, :Cp]           # [1, Cp]    fc3 weight row (zero-padded)
    b3 = bias_ref[3:4, 0:1]           # [1, 1]

    # [G, B, D] -> [G*B, D] is layout-preserving when B is a multiple of 8.
    x = x_ref[...].reshape(G * B, D)

    def gated_branch(y):
        # y: [G*B, 2Cp] — first Cp lanes = linear output, last Cp = branch logits.
        a = y[:, :Cp]                                   # tile-aligned split
        z = y[:, Cp:].reshape(G, B, Cp)                 # per-instance groups
        # softmax over the batch axis (dim=0 of each instance), per column
        z = z - jnp.max(z, axis=1, keepdims=True)
        e = jnp.exp(z)
        sm = (e / jnp.sum(e, axis=1, keepdims=True)).reshape(G * B, Cp)
        # gate + relu (dropout = identity in eval).  Padded columns: a == 0.
        return jnp.maximum(a * sm, 0.0)

    # --- stage 1: one fused MXU matmul for fc1 and nsb1 ---
    y1 = jnp.dot(x, w1, preferred_element_type=jnp.float32) + ba    # [G*B, 2Cp]
    x3 = gated_branch(y1)                                           # [G*B, Cp]

    # --- stage 2: one fused MXU matmul for fc2 and nsb2 ---
    y2 = jnp.dot(x3, w2, preferred_element_type=jnp.float32) + bb   # [G*B, 2Cp]
    x5 = gated_branch(y2)                                           # [G*B, Cp]

    # --- fc3 as VPU multiply + XLU row-sum + sigmoid ---
    x6 = jnp.sum(x5 * w3, axis=-1, keepdims=True) + b3              # [G*B, 1]
    out_ref[...] = jax.nn.sigmoid(x6).reshape(G, B, 1)


def pack_params(p, cp=128):
    """Fuse + lane-pad weights into two slabs (3 input DMAs total incl. x)."""
    w1, b1, wn1, bn1 = p["w1"], p["b1"], p["wn1"], p["bn1"]
    w2, b2, wn2, bn2 = p["w2"], p["b2"], p["wn2"], p["bn2"]
    w3, b3 = p["w3"], p["b3"]
    D, H = w1.shape
    O = w2.shape[1]
    assert H <= cp and O <= cp  # TODO(synk): tile features for H/O > 128

    def padc(a, width):
        return jnp.pad(a, ((0, 0), (0, width - a.shape[1])))

    # stage-1 fused weights [D, 2cp]; stage-2 fused weights [cp, 2cp]
    wa = jnp.concatenate([padc(w1, cp), padc(wn1, cp)], axis=1)
    wb = jnp.concatenate([padc(w2, cp), padc(wn2, cp)], axis=1)
    wb = jnp.pad(wb, ((0, cp - H), (0, 0)))
    w_slab = jnp.concatenate([wa, wb], axis=0)                       # [D+cp, 2cp]

    ba = jnp.concatenate([padc(b1, cp), padc(bn1, cp)], axis=1)      # [1, 2cp]
    bb = jnp.concatenate([padc(b2, cp), padc(bn2, cp)], axis=1)      # [1, 2cp]
    w3row = padc(w3.T, 2 * cp)                                       # [1, 2cp]
    b3row = padc(b3, 2 * cp)                                         # [1, 2cp]
    bias_slab = jnp.concatenate([ba, bb, w3row, b3row], axis=0)      # [4, 2cp]

    return dict(w_slab=w_slab, bias_slab=bias_slab)


def bbn_forward(x, packed, instances_per_step=8):
    """x: [N, B, D] (N independent instances) or a single [B, D]."""
    squeeze = x.ndim == 2
    if squeeze:
        x = x[None]
    N, B, D = x.shape
    G = min(instances_per_step, N)
    n_steps = pl.cdiv(N, G)
    Npad = n_steps * G
    if Npad != N:
        x = jnp.pad(x, ((0, Npad - N), (0, 0), (0, 0)))  # zero instances are safe

    w_slab, bias_slab = packed["w_slab"], packed["bias_slab"]
    out = pl.pallas_call(
        _bbn_kernel,
        out_shape=jax.ShapeDtypeStruct((Npad, B, 1), jnp.float32),
        grid=(n_steps,),
        in_specs=[
            pl.BlockSpec((G, B, D), lambda i: (i, 0, 0)),        # per-step chunk
            pl.BlockSpec(w_slab.shape, lambda i: (0, 0)),        # resident weights
            pl.BlockSpec(bias_slab.shape, lambda i: (0, 0)),     # resident biases
        ],
        out_specs=pl.BlockSpec((G, B, 1), lambda i: (i, 0, 0)),
        compiler_params=pltpu.CompilerParams(
            dimension_semantics=("parallel",)),                  # v7x: 2nd TC
    )(x, w_slab, bias_slab)

    out = out[:N]
    return out[0] if squeeze else out


def init_params(key, input_size, hidden_size, output_size):
    """Deterministic init.  Weights are stored PRE-TRANSPOSED: [in, out]."""
    ks = jax.random.split(key, 10)

    def lin(kw, kb, fan_in, fan_out):
        bound = 1.0 / jnp.sqrt(fan_in)
        w = jax.random.uniform(kw, (fan_in, fan_out), jnp.float32, -bound, bound)
        b = jax.random.uniform(kb, (1, fan_out), jnp.float32, -bound, bound)
        return w, b

    w1, b1 = lin(ks[0], ks[1], input_size, hidden_size)     # fc1
    wn1, bn1 = lin(ks[2], ks[3], input_size, hidden_size)   # nsb1.fc
    w2, b2 = lin(ks[4], ks[5], hidden_size, output_size)    # fc2
    wn2, bn2 = lin(ks[6], ks[7], hidden_size, output_size)  # nsb2.fc
    w3, b3 = lin(ks[8], ks[9], output_size, 1)              # fc3
    return dict(w1=w1, b1=b1, wn1=wn1, bn1=bn1,
                w2=w2, b2=b2, wn2=wn2, bn2=bn2,
                w3=w3, b3=b3)


def bbn_reference(x, p):
    """Plain-JAX reference of the PyTorch forward (eval mode)."""
    hp = jax.lax.Precision.HIGHEST

    def one(xi):
        x1 = jnp.dot(xi, p["w1"], precision=hp) + p["b1"]
        n1 = jax.nn.softmax(jnp.dot(xi, p["wn1"], precision=hp) + p["bn1"], axis=0)
        x3 = jax.nn.relu(x1 * n1)
        x4 = jnp.dot(x3, p["w2"], precision=hp) + p["b2"]
        n2 = jax.nn.softmax(jnp.dot(x3, p["wn2"], precision=hp) + p["bn2"], axis=0)
        x5 = jax.nn.relu(x4 * n2)
        return jax.nn.sigmoid(jnp.dot(x5, p["w3"], precision=hp) + p["b3"])

    return jax.vmap(one)(x) if x.ndim == 3 else one(x)


if __name__ == "__main__":
    # N independent instances, each: batch=8, input=32, hidden=64, output=16
    N, B, D, H, O = 16, 8, 32, 64, 16

    key = jax.random.PRNGKey(0)
    kx, kp = jax.random.split(key)
    x = jax.random.normal(kx, (N, B, D), jnp.float32)
    params = init_params(kp, D, H, O)
    packed = jax.tree.map(jax.block_until_ready, pack_params(params))

    # batched run: grid over instance chunks, weights VMEM-resident
    out = jax.block_until_ready(bbn_forward(x, packed))
    ref = bbn_reference(x, params)
    assert out.shape == (N, B, 1)
    # exact softmax division -> near-bit parity with the f32 reference
    assert jnp.allclose(out, ref, atol=1e-4, rtol=1e-4), "batched mismatch"

    # single-instance path (original module interface: [B, D] -> [B, 1])
    out1 = jax.block_until_ready(bbn_forward(x[0], packed))
    assert out1.shape == (B, 1)
    assert jnp.allclose(out1, bbn_reference(x[0], params), atol=1e-4, rtol=1e-4), \
        "single-instance mismatch"

    print("KERNEL_OK")
</pallas_src>

<mosaic_0001>
module attributes {stable_mosaic.version = 11 : i64} {
  func.func @_bbn_kernel(%arg0: i32, %arg1: memref<8x8x32xf32, #tpu.memory_space<vmem>>, %arg2: memref<160x256xf32, #tpu.memory_space<vmem>>, %arg3: memref<4x256xf32, #tpu.memory_space<vmem>>, %arg4: memref<8x8x1xf32, #tpu.memory_space<vmem>>) attributes {dimension_semantics = [#tpu.dimension_semantics<parallel>], iteration_bounds = array<i64: 2>, scalar_prefetch = 0 : i64, scratch_operands = 0 : i64, tpu.core_type = #tpu.core_type<tc>, window_params = [{transform_indices = @transform_0, window_bounds = array<i64: 8, 8, 32>}, {pipeline_mode = #tpu.pipeline_mode<synchronous>, transform_indices = @transform_1, window_bounds = array<i64: 160, 256>}, {pipeline_mode = #tpu.pipeline_mode<synchronous>, transform_indices = @transform_2, window_bounds = array<i64: 4, 256>}, {transform_indices = @transform_3, window_bounds = array<i64: 8, 8, 1>}]} {
    %c0 = arith.constant 0 : index
    %c0_0 = arith.constant 0 : index
    %0 = vector.load %arg2[%c0, %c0_0] : memref<160x256xf32, #tpu.memory_space<vmem>>, vector<32x256xf32>
    %c32 = arith.constant 32 : index
    %c0_1 = arith.constant 0 : index
    %1 = vector.load %arg2[%c32, %c0_1] : memref<160x256xf32, #tpu.memory_space<vmem>>, vector<128x256xf32>
    %c0_2 = arith.constant 0 : index
    %c0_3 = arith.constant 0 : index
    %2 = vector.load %arg3[%c0_2, %c0_3] : memref<4x256xf32, #tpu.memory_space<vmem>>, vector<1x256xf32>
    %c1 = arith.constant 1 : index
    %c0_4 = arith.constant 0 : index
    %3 = vector.load %arg3[%c1, %c0_4] : memref<4x256xf32, #tpu.memory_space<vmem>>, vector<1x256xf32>
    %c2 = arith.constant 2 : index
    %c0_5 = arith.constant 0 : index
    %4 = vector.load %arg3[%c2, %c0_5] : memref<4x256xf32, #tpu.memory_space<vmem>>, vector<1x128xf32>
    %c3 = arith.constant 3 : index
    %c0_6 = arith.constant 0 : index
    %5 = vector.load %arg3[%c3, %c0_6] : memref<4x256xf32, #tpu.memory_space<vmem>>, vector<1x1xf32>
    %c0_7 = arith.constant 0 : index
    %c0_8 = arith.constant 0 : index
    %c0_9 = arith.constant 0 : index
    %6 = vector.load %arg1[%c0_7, %c0_8, %c0_9] : memref<8x8x32xf32, #tpu.memory_space<vmem>>, vector<8x8x32xf32>
    %7 = vector.shape_cast %6 : vector<8x8x32xf32> to vector<64x32xf32>
    %cst = arith.constant dense<0.000000e+00> : vector<64x256xf32>
    %8 = tpu.matmul %7, %0, %cst {dimension_numbers = #tpu.dot_dimension_numbers<[1], [0], [0], [1], [0, 0, 1, 1], [], []>} : vector<64x32xf32>, vector<32x256xf32>, vector<64x256xf32> -> vector<64x256xf32>
    %9 = vector.broadcast %2 : vector<1x256xf32> to vector<64x256xf32>
    %10 = arith.addf %8, %9 : vector<64x256xf32>
    %11 = vector.extract_strided_slice %10 {offsets = [0, 0], sizes = [64, 128], strides = [1, 1]} : vector<64x256xf32> to vector<64x128xf32>
    %12 = vector.extract_strided_slice %10 {offsets = [0, 128], sizes = [64, 128], strides = [1, 1]} : vector<64x256xf32> to vector<64x128xf32>
    %13 = vector.shape_cast %12 : vector<64x128xf32> to vector<8x8x128xf32>
    %cst_10 = arith.constant dense<0xFF800000> : vector<8x128xf32>
    %14 = vector.multi_reduction <maximumf>, %13, %cst_10 [1] : vector<8x8x128xf32> to vector<8x128xf32>
    %15 = vector.shape_cast %14 : vector<8x128xf32> to vector<8x1x128xf32>
    %16 = vector.broadcast %15 : vector<8x1x128xf32> to vector<8x8x128xf32>
    %17 = arith.subf %13, %16 : vector<8x8x128xf32>
    %18 = math.exp %17 : vector<8x8x128xf32>
    %cst_11 = arith.constant dense<0.000000e+00> : vector<8x128xf32>
    %19 = vector.multi_reduction <add>, %18, %cst_11 [1] : vector<8x8x128xf32> to vector<8x128xf32>
    %20 = vector.shape_cast %19 : vector<8x128xf32> to vector<8x1x128xf32>
    %21 = vector.broadcast %20 : vector<8x1x128xf32> to vector<8x8x128xf32>
    %22 = arith.divf %18, %21 : vector<8x8x128xf32>
    %23 = vector.shape_cast %22 : vector<8x8x128xf32> to vector<64x128xf32>
    %24 = arith.mulf %11, %23 : vector<64x128xf32>
    %cst_12 = arith.constant 0.000000e+00 : f32
    %25 = vector.broadcast %cst_12 : f32 to vector<64x128xf32>
    %26 = arith.maximumf %24, %25 : vector<64x128xf32>
    %cst_13 = arith.constant dense<0.000000e+00> : vector<64x256xf32>
    %27 = tpu.matmul %26, %1, %cst_13 {dimension_numbers = #tpu.dot_dimension_numbers<[1], [0], [0], [1], [0, 0, 1, 1], [], []>} : vector<64x128xf32>, vector<128x256xf32>, vector<64x256xf32> -> vector<64x256xf32>
    %28 = vector.broadcast %3 : vector<1x256xf32> to vector<64x256xf32>
    %29 = arith.addf %27, %28 : vector<64x256xf32>
    %30 = vector.extract_strided_slice %29 {offsets = [0, 0], sizes = [64, 128], strides = [1, 1]} : vector<64x256xf32> to vector<64x128xf32>
    %31 = vector.extract_strided_slice %29 {offsets = [0, 128], sizes = [64, 128], strides = [1, 1]} : vector<64x256xf32> to vector<64x128xf32>
    %32 = vector.shape_cast %31 : vector<64x128xf32> to vector<8x8x128xf32>
    %cst_14 = arith.constant dense<0xFF800000> : vector<8x128xf32>
    %33 = vector.multi_reduction <maximumf>, %32, %cst_14 [1] : vector<8x8x128xf32> to vector<8x128xf32>
    %34 = vector.shape_cast %33 : vector<8x128xf32> to vector<8x1x128xf32>
    %35 = vector.broadcast %34 : vector<8x1x128xf32> to vector<8x8x128xf32>
    %36 = arith.subf %32, %35 : vector<8x8x128xf32>
    %37 = math.exp %36 : vector<8x8x128xf32>
    %cst_15 = arith.constant dense<0.000000e+00> : vector<8x128xf32>
    %38 = vector.multi_reduction <add>, %37, %cst_15 [1] : vector<8x8x128xf32> to vector<8x128xf32>
    %39 = vector.shape_cast %38 : vector<8x128xf32> to vector<8x1x128xf32>
    %40 = vector.broadcast %39 : vector<8x1x128xf32> to vector<8x8x128xf32>
    %41 = arith.divf %37, %40 : vector<8x8x128xf32>
    %42 = vector.shape_cast %41 : vector<8x8x128xf32> to vector<64x128xf32>
    %43 = arith.mulf %30, %42 : vector<64x128xf32>
    %cst_16 = arith.constant 0.000000e+00 : f32
    %44 = vector.broadcast %cst_16 : f32 to vector<64x128xf32>
    %45 = arith.maximumf %43, %44 : vector<64x128xf32>
    %46 = vector.broadcast %4 : vector<1x128xf32> to vector<64x128xf32>
    %47 = arith.mulf %45, %46 : vector<64x128xf32>
    %cst_17 = arith.constant dense<0.000000e+00> : vector<64xf32>
    %48 = vector.multi_reduction <add>, %47, %cst_17 [1] : vector<64x128xf32> to vector<64xf32>
    %49 = vector.shape_cast %48 : vector<64xf32> to vector<64x1xf32>
    %50 = vector.broadcast %5 : vector<1x1xf32> to vector<64x1xf32>
    %51 = arith.addf %49, %50 : vector<64x1xf32>
    %52 = arith.negf %51 : vector<64x1xf32>
    %53 = math.exp %52 : vector<64x1xf32>
    %cst_18 = arith.constant 1.000000e+00 : f32
    %54 = vector.broadcast %cst_18 : f32 to vector<64x1xf32>
    %55 = arith.addf %54, %53 : vector<64x1xf32>
    %56 = arith.divf %54, %55 : vector<64x1xf32>
    %57 = vector.shape_cast %56 : vector<64x1xf32> to vector<8x8x1xf32>
    %c0_19 = arith.constant 0 : index
    %c0_20 = arith.constant 0 : index
    %c0_21 = arith.constant 0 : index
    %58 = vector.load %arg4[%c0_19, %c0_20, %c0_21] : memref<8x8x1xf32, #tpu.memory_space<vmem>>, vector<8x8x1xf32>
    tpu.vector_store %arg4[%c0_19, %c0_20, %c0_21], %57 {strides = array<i32>} : memref<8x8x1xf32, #tpu.memory_space<vmem>>, vector<8x8x1xf32>,
    return
  }
  func.func @transform_0(%arg0: i32) -> (i32, i32, i32) {
    %c0_i32 = arith.constant 0 : i32
    %c0_i32_0 = arith.constant 0 : i32
    %c0_i32_1 = arith.constant 0 : i32
    return %arg0, %c0_i32, %c0_i32_0 : i32, i32, i32
  }
  func.func @transform_1(%arg0: i32) -> (i32, i32) {
    %c0_i32 = arith.constant 0 : i32
    %c0_i32_0 = arith.constant 0 : i32
    %c0_i32_1 = arith.constant 0 : i32
    return %c0_i32, %c0_i32_0 : i32, i32
  }
  func.func @transform_2(%arg0: i32) -> (i32, i32) {
    %c0_i32 = arith.constant 0 : i32
    %c0_i32_0 = arith.constant 0 : i32
    %c0_i32_1 = arith.constant 0 : i32
    return %c0_i32, %c0_i32_0 : i32, i32
  }
  func.func @transform_3(%arg0: i32) -> (i32, i32, i32) {
    %c0_i32 = arith.constant 0 : i32
    %c0_i32_0 = arith.constant 0 : i32
    %c0_i32_1 = arith.constant 0 : i32
    return %arg0, %c0_i32, %c0_i32_0 : i32, i32, i32
  }
}

</mosaic_0001>

<bundles_post_ra>
// kernel: tpu_custom_call.1
= control target key start
LH: loop header
LB: loop body
LE: loop exit
PB: predicated region body
PF: predicated region fallthrough
CT: control target
= control target key end

     0   :  { %8 = vsyncpa [#allocation3], 0  ;;  %s1858_s0 = inlined_call_operand.hbm [shape: f32[16,8,32], index: 0, kind: input, shape index: {}]   ;;  %s1859_s1 = inlined_call_operand.hbm [shape: f32[160,256], index: 1, kind: input, shape index: {}]   ;;  %s1860_s2 = inlined_call_operand.hbm [shape: f32[4,256], index: 2, kind: input, shape index: {}]   ;;  %s1861_s3 = inlined_call_operand.vmem [shape: f32[16,8,1], index: 3, kind: output, shape index: {}]  }
   0x1   :  { %10 = vsyncpa [#allocation3 + $0x1], 0 }
   0x2   :  { %11 = vsyncpa [#allocation5], 0  ;;  %s1440_s12 = smov 0   ;;  %s1442_s13 = smov 0  }
   0x3   :  { %s1444_s14 = smov 0   ;;  %s1446_s15 = smov 0  }
   0x4 LB: > { %s1033_s16 = sadd.s32 4294967295, %s1410_s15   ;;  %p37_p0 = scmp.ne.s32.totalorder %s1402_s13, %s1398_s12  ;;  %s1410_s15 = sphi %s1446_s15, %s1877_s15   ;;  %s1406_s14 = sphi %s1444_s14, %s1876_s14   ;;  %s1402_s13 = sphi %s1442_s13, %s1875_s13   ;;  %s1398_s12 = sphi %s1440_s12, %s1874_s12  }
   0x5   : > { %p1462_p1 = scmp.eq.s32.totalorder %s1033_s16, 0  ;;  %p1035_p2 = scmp.ge.s32.totalorder %s1410_s15, 1 }
   0x6   : > { %p116_p3 = scmp.lt.s32.totalorder %s1410_s15, 3  ;;  %s1412_s20 = smov [#allocation4]  }
   0x7   : > { %s1866_s17 = scalar_select %p1462_p1, 1, 0 }
   0x8   : > { %p1470_p4 = por %p1462_p1, %p37_p0  ;;  %p1474_p5 = pnand %p1035_p2, %p116_p3 }
   0x9   : > { %s128_s21 = sshll.u32 %s1412_s20, 4  ;;  %s1413_s23 = smov [#allocation6]   ;;  %s129_s21 = int_to_ptr.vmem [resolvable:$true] %s128_s21 }
   0xa   : > { %s1867_s18 = scalar_select %p1470_p4, 1, 0 }
   0xb   : > { %s1868_s19 = scalar_select %p1474_p5, 1, 0 }
   0xc   : > { %p1135_p6 = pneg %p1474_p5  ;;  %s142_s24 = sshll.u32 %s1413_s23, 4  ;;  %s1486_s24 = int_to_ptr.vmem [resolvable:$true] %s142_s24 }
   0xd   : > { %s1286_s27 = scalar_lea.hbm %s1859_s1, 5120 }
   0xe   : > { %p1482_p7 = pnand %p1135_p6, %p1462_p1  ;;  %p1287_p8 = scmp.ne.s32.totalorder %s1859_s1, %s1286_s27 }
   0xf   : > { %p1293_p12 = scmp.lt.u32.totalorder %s1286_s27, %s1859_s1 }
  0x10   : > { %p1288_p9 = pneg %p1482_p7 }
  0x12   : > { %p1289_p10 = pnand %p1288_p9, %p1287_p8 }
  0x14   : > { %p1290_p11 = pneg %p1289_p10 }
  0x16   : > { %p1295_p13 = pnand %p1293_p12, %p1290_p11 }
  0x18   : > { %1298 = shalt.err (!%p1295_p13)
}
  0x19   : > { %s1299_s5 = scalar_lea.vmem %s129_s21, 5120  ;;  %p1307_p6 = scmp.lt.s32.totalorder %s129_s21, %s129_s21 }
  0x1a   : > { %p1300_p0 = scmp.ne.s32.totalorder %s129_s21, %s1299_s5  ;;  %p1308_p1 = scmp.lt.s32.totalorder %s1299_s5, %s1299_s5 }
  0x1c   : > { %p1302_p2 = pnand %p1300_p0, %p1288_p9  ;;  %p1309_p4 = por %p1308_p1, %p1307_p6 }
  0x1e   : > { %p1303_p3 = pneg %p1302_p2 }
  0x20   : > { %p1310_p5 = pnand %p1309_p4, %p1303_p3 }
  0x22   : > { %1313 = shalt.err (!%p1310_p5)
}
  0x23   : > { %s1414_s6 = smov 256   ;;  %s1415_s7 = smov 16  }
  0x24   : > { %1138 = dma.hbm_to_vmem [thread:$0]  (!%p1482_p7), %s1859_s1, 5120, %s129_s21, [#allocation5], %s1414_s6, %s1414_s6, %s1415_s7  }
  0x25   : > { %s1314_s12 = scalar_lea.hbm %s1860_s2, 128 }
  0x26   : > { %p1315_p8 = scmp.ne.s32.totalorder %s1860_s2, %s1314_s12  ;;  %p1321_p5 = scmp.lt.u32.totalorder %s1314_s12, %s1860_s2 }
  0x28   : > { %p1317_p1 = pnand %p1315_p8, %p1288_p9 }
  0x2a   : > { %p1318_p4 = pneg %p1317_p1 }
  0x2c   : > { %p1323_p10 = pnand %p1321_p5, %p1318_p4 }
  0x2e   : > { %1326 = shalt.err (!%p1323_p10)
}
  0x2f   : > { %s1327_s21 = scalar_lea.vmem %s1486_s24, 128  ;;  %p1335_p0 = scmp.lt.s32.totalorder %s1486_s24, %s1486_s24 }
  0x30   : > { %p1328_p11 = scmp.ne.s32.totalorder %s1486_s24, %s1327_s21  ;;  %p1336_p2 = scmp.lt.s32.totalorder %s1327_s21, %s1327_s21 }
  0x32   : > { %p1330_p12 = pnand %p1328_p11, %p1288_p9  ;;  %p1337_p3 = por %p1336_p2, %p1335_p0 }
  0x34   : > { %p1331_p13 = pneg %p1330_p12 }
  0x36   : > { %p1338_p6 = pnand %p1337_p3, %p1331_p13 }
  0x38   : > { %1341 = shalt.err (!%p1338_p6)
}
  0x39   : > { %1141 = dma.hbm_to_vmem [thread:$0]  (!%p1482_p7), %s1860_s2, 128, %s1486_s24, [#allocation5]  }
  0x3a   : > { %s1536_s29 = sadd.s32 1, %s1410_s15   ;;  %s24_s30 = sadd.s32 1, %s1406_s14 }
  0x3b   : > { %s21_s22 = ssub.s32 %s1410_s15, %s1536_s29  ;;  %p31_p9 = scmp.ne.s32.totalorder %s1406_s14, %s1402_s13 }
  0x3c   : > { %p22_p8 = scmp.eq.s32.totalorder %s21_s22, 0  ;;  %p32_p1 = scmp.eq.s32.totalorder %s1410_s15, 0 }
  0x3d   : > { %p1148_p4 = scmp.lt.s32.totalorder %s1410_s15, 2  ;;  %s153_s4 = sand.u32 1, %s1406_s14  }
  0x3e   : > { %s1547_s5 = scalar_select %p22_p8, %s1406_s14, %s24_s30  }
  0x3f   : > { %p33_p5 = por %p32_p1, %p31_p9  ;;  %s1039_s6 = sshll.u32 %s153_s4, 6 }
  0x40   : > { %s1068_s7 = sshll.u32 %s1410_s15, 10  ;;  %s157_s24 = scalar_lea.vmem [#allocation2], %s1039_s6 }
  0x41   : > { %s1553_s10 = scalar_lea.hbm %s1858_s0, %s1068_s7  ;;  %s164_s11 = sshll.u32 %s157_s24, 4  ;;  %s1559_s11 = int_to_ptr.vmem [resolvable:$true] %s164_s11 }
  0x42   : > { %p1555_p7 = pnand %p1148_p4, %p33_p5  ;;  %s1561_s20 = scalar_lea.sflag [#allocation3], %s153_s4 }
  0x43   : > { %s1342_s23 = scalar_lea.hbm %s1553_s10, 1024  ;;  %s1347_s21 = scalar_lea.hbm %s1858_s0, 2048 }
  0x44   : > { %p1343_p10 = scmp.ne.s32.totalorder %s1553_s10, %s1342_s23  ;;  %p1344_p11 = pneg %p1555_p7 }
  0x45   : > { %p1348_p0 = scmp.lt.u32.totalorder %s1553_s10, %s1858_s0  ;;  %p1349_p2 = scmp.lt.u32.totalorder %s1347_s21, %s1342_s23 }
  0x46   : > { %p1345_p12 = pnand %p1344_p11, %p1343_p10  ;;  %p1351_p6 = scmp.lt.u32.totalorder %s1342_s23, %s1553_s10 }
  0x47   : > { %p1350_p3 = por %p1349_p2, %p1348_p0 }
  0x48   : > { %p1346_p13 = pneg %p1345_p12 }
  0x49   : > { %p1352_p9 = por %p1351_p6, %p1350_p3 }
  0x4b   : > { %p1353_p8 = pnand %p1352_p9, %p1346_p13 }
  0x4d   : > { %1356 = shalt.err (!%p1353_p8)
}
  0x4e   : > { %s1357_s30 = scalar_lea.vmem %s1559_s11, 1024  ;;  %s1416_s22 = smov [#allocation2]  }
  0x4f   : > { %p1358_p1 = scmp.ne.s32.totalorder %s1559_s11, %s1357_s30  ;;  %s1362_s4 = sshll.u32 %s1416_s22, 4  ;;  %s1363_s4 = int_to_ptr.vmem [resolvable:$false] %s1362_s4 }
  0x50   : > { %s1364_s6 = scalar_lea.vmem %s1363_s4, 2048  ;;  %p1365_p10 = scmp.lt.s32.totalorder %s1559_s11, %s1363_s4 }
  0x51   : > { %p1360_p4 = pnand %p1358_p1, %p1344_p11  ;;  %p1366_p12 = scmp.lt.s32.totalorder %s1364_s6, %s1357_s30 }
  0x53   : > { %p1361_p5 = pneg %p1360_p4  ;;  %p1367_p0 = por %p1366_p12, %p1365_p10 }
  0x55   : > { %p1368_p2 = pnand %p1367_p0, %p1361_p5 }
  0x57   : > { %1371 = shalt.err (!%p1368_p2)
}
  0x58   : > { %s1417_s7 = smov 128   ;;  %s1418_s8 = smov 8  }
  0x59   : > { %1145 = dma.hbm_to_vmem [thread:$0]  (!%p1555_p7), %s1553_s10, 1024, %s1559_s11, %s1561_s20, %s1417_s7, %s1417_s7, %s1418_s8  }
  0x5a   : > { %p1871_p11 = scmp.ne.s32.totalorder %s1868_s19, 0 }
  0x5b   : > { %s178_s9 = sand.u32 (!%p1871_p11), 1, %s1402_s13   ;;  %p1872_p13 = scmp.ne.s32.totalorder (!%p1871_p11), %s1867_s18, 0 }
  0x5c   : > { %176 = sbr.rel (%p1871_p11) target bundleno = 858 (0x35a), region = 32  ;;  %s1043_s24 = sshll.u32 (!%p1871_p11), %s178_s9, 6 }
  0x5d   : > { %s179_s23 = scalar_lea.sflag (!%p1871_p11), [#allocation3], %s178_s9  ;;  %s1592_s25 = scalar_lea.vmem (!%p1871_p11), [#allocation2], %s1043_s24 }
  0x63   : > { %1389 = dma.done.wait (%p1872_p13), %s179_s23, 1024  }
  0x64   : > { %1391 = vsyncadd (%p1872_p13), %s179_s23, 4294966272  ;;  %p1873_p3 = scmp.ne.s32.totalorder %s1866_s17, 0 }
  0x66   : > { %1393 = dma.done.wait (%p1873_p3), [#allocation5], 5248  }
  0x67   : > { %1395 = vsyncadd (%p1873_p3), [#allocation5], 4294962048  ;;  %v1419_v0 = vmov 0.0   ;;  %v221_v1 = vld [vmem:[#allocation4 + $0x8] sm:$0xff]  ;;  %v223_v2 = vld [vmem:[#allocation4 + $0x18] sm:$0xff]  ;;  %vm284_vm0 = vcmask 261120  }
  0x68   : > { %373 = vmatprep.mubr.f32.mxu0 %v1419_v0  ;;  %667 = vmatprep.mubr.f32.mxu1 %v1419_v0  ;;  %v220_v3 = vld [vmem:[#allocation4] sm:$0xff]  ;;  %v1069_v4 = vpack.c.bf16 %v223_v2, %v221_v1  ;;  %v222_v5 = vld [vmem:[#allocation4 + $0x10] sm:$0xff]  ;;  %v225_v6 = vld [vmem:[#allocation4 + $0x28] sm:$0xff]  ;;  %s1046_s17 = sshll.u32 %s1033_s16, 3  ;;  %vm938_vm1 = vcmask 7168  }
  0x69   : > { %v227_v7 = vld [vmem:[#allocation4 + $0x38] sm:$0xff]  ;;  %v1071_v8 = vpack.c.bf16 %v222_v5, %v220_v3  ;;  %v224_v10 = vld [vmem:[#allocation4 + $0x20] sm:$0xff]  ;;  %v226_v11 = vld [vmem:[#allocation4 + $0x30] sm:$0xff]  ;;  %p215_p7 = scmp.lt.s32.totalorder %s1046_s17, 15 }
  0x6a   : > { %v1073_v9 = vpack.c.bf16 %v227_v7, %v225_v6  ;;  %1070 = vmatprep.subr.bf16.mxu0 %v1069_v4  ;;  %v1075_v12 = vpack.c.bf16 %v226_v11, %v224_v10  ;;  %v265_v13 = vld [vmem:[%s1592_s25] sm:$0xff]  ;;  %v266_v14 = vld [vmem:[%s1592_s25 + $0x8] sm:$0xff]  ;;  %v267_v15 = vld [vmem:[%s1592_s25 + $0x10] sm:$0xff]  ;;  %v274_v6 = vlaneseq }
  0x6b   : > { %1072 = vmatpush1.bf16.msra.mxu0 %v1071_v8  ;;  %v268_v16 = vld [vmem:[%s1592_s25 + $0x18] sm:$0xff]  ;;  %v269_v17 = vld [vmem:[%s1592_s25 + $0x20] sm:$0xff]  ;;  %v270_v18 = vld [vmem:[%s1592_s25 + $0x28] sm:$0xff]  ;;  %s1879_s17 = smov (!%p215_p7, %s1046_s17), 15 }
  0x6c   : > { %1074 = vmatprep.subr.bf16.mxu0 %v1073_v9  ;;  %v271_v19 = vld [vmem:[%s1592_s25 + $0x30] sm:$0xff]  ;;  %v272_v20 = vld [vmem:[%s1592_s25 + $0x38] sm:$0xff]  ;;  %v229_v21 = vld [vmem:[#allocation4 + $0x48] sm:$0xff]  ;;  %v1628_v7 = vshrl.u32 %v274_v6, 7  ;;  %s1047_s15 = sshll.u32 %s1879_s17, 3 }
  0x6d   : > { %v231_v22 = vld [vmem:[#allocation4 + $0x58] sm:$0xff]  ;;  %v228_v24 = vld [vmem:[#allocation4 + $0x40] sm:$0xff]  ;;  %v230_v25 = vld [vmem:[#allocation4 + $0x50] sm:$0xff]  ;;  %s1827_s19 = scalar_lea.vmem %s1861_s3, %s1047_s15 }
  0x6e   : > { %v1077_v23 = vpack.c.bf16 %v231_v22, %v229_v21  ;;  %v1079_v26 = vpack.c.bf16 %v230_v25, %v228_v24  ;;  %v233_v27 = vld [vmem:[#allocation4 + $0x68] sm:$0xff]  ;;  %v235_v28 = vld [vmem:[#allocation4 + $0x78] sm:$0xff]  ;;  %v232_v30 = vld [vmem:[#allocation4 + $0x60] sm:$0xff]  ;;  %v280_v8 = vsub.s32 1, %v1628_v7 }
  0x6f   : > { %1076 = vmatpush1.bf16.msra.mxu0 %v1075_v12  ;;  %v1081_v29 = vpack.c.bf16 %v235_v28, %v233_v27  ;;  %v234_v31 = vld [vmem:[#allocation4 + $0x70] sm:$0xff]  ;;  %v237_v33 = vld [vmem:[#allocation4 + $0x88] sm:$0xff]  ;;  %v239_v34 = vld [vmem:[#allocation4 + $0x98] sm:$0xff] }
  0x70   : > { %1078 = vmatprep.subr.bf16.mxu0 %v1077_v23  ;;  %1109 = vmatprep.subr.bf16.mxu1 %v1077_v23  ;;  %v1083_v32 = vpack.c.bf16 %v234_v31, %v232_v30  ;;  %v1085_v35 = vpack.c.bf16 %v239_v34, %v237_v33  ;;  %v236_v36 = vld [vmem:[#allocation4 + $0x80] sm:$0xff]  ;;  %v238_v37 = vld [vmem:[#allocation4 + $0x90] sm:$0xff]  ;;  %v241_v39 = vld [vmem:[#allocation4 + $0xa8] sm:$0xff] }
  0x71   : > { %1117 = vmatpush1.bf16.msra.mxu1 %v1079_v26  ;;  %v1087_v38 = vpack.c.bf16 %v238_v37, %v236_v36  ;;  %v243_v40 = vld [vmem:[#allocation4 + $0xb8] sm:$0xff]  ;;  %v240_v42 = vld [vmem:[#allocation4 + $0xa0] sm:$0xff]  ;;  %v242_v43 = vld [vmem:[#allocation4 + $0xb0] sm:$0xff] }
  0x72   : > { %1048 = vmatmul.mubr.msk.f32.vlgmr.msra.gmra.mrb[0].mxu0 %vm284_vm0, %v265_v13  ;;  %1110 = vmatprep.subr.bf16.mxu1 %v1081_v29  ;;  %v1089_v41 = vpack.c.bf16 %v243_v40, %v241_v39  ;;  %v1091_v44 = vpack.c.bf16 %v242_v43, %v240_v42  ;;  %v245_v45 = vld [vmem:[#allocation4 + $0xc8] sm:$0xff]  ;;  %v247_v46 = vld [vmem:[#allocation4 + $0xd8] sm:$0xff]  ;;  %v244_v48 = vld [vmem:[#allocation4 + $0xc0] sm:$0xff] }
  0x73   : > { %379 = vmatprep.mubr.f32.mxu0 %v1419_v0  ;;  %1080 = vmatpush1.bf16.msra.mxu0 %v1079_v26  ;;  %v1093_v47 = vpack.c.bf16 %v247_v46, %v245_v45  ;;  %v246_v49 = vld [vmem:[#allocation4 + $0xd0] sm:$0xff]  ;;  %v249_v51 = vld [vmem:[#allocation4 + $0xe8] sm:$0xff]  ;;  %v251_v52 = vld [vmem:[#allocation4 + $0xf8] sm:$0xff] }
  0x74   : > { %1082 = vmatprep.subr.bf16.mxu0 %v1081_v29  ;;  %v1095_v50 = vpack.c.bf16 %v246_v49, %v244_v48  ;;  %v1097_v53 = vpack.c.bf16 %v251_v52, %v249_v51  ;;  %v248_v54 = vld [vmem:[#allocation4 + $0xe0] sm:$0xff]  ;;  %v250_v55 = vld [vmem:[#allocation4 + $0xf0] sm:$0xff]  ;;  %v253_v57 = vld [vmem:[#allocation4 + $0x108] sm:$0xff] }
  0x75   : > { %1118 = vmatpush1.bf16.msra.mxu1 %v1083_v32  ;;  %v1099_v56 = vpack.c.bf16 %v250_v55, %v248_v54  ;;  %v255_v58 = vld [vmem:[#allocation4 + $0x118] sm:$0xff]  ;;  %v252_v59 = vld [vmem:[#allocation4 + $0x100] sm:$0xff]  ;;  %v254_v61 = vld [vmem:[#allocation4 + $0x110] sm:$0xff] }
  0x76   : > { %1049 = vmatmul.mubr.msk.f32.gmra.mrb[2].mxu0 %vm284_vm0, %v266_v14  ;;  %1111 = vmatprep.subr.bf16.mxu1 %v1085_v35  ;;  %v1101_v60 = vpack.c.bf16 %v255_v58, %v253_v57  ;;  %v257_v62 = vld [vmem:[#allocation4 + $0x128] sm:$0xff]  ;;  %v259_v63 = vld [vmem:[#allocation4 + $0x138] sm:$0xff]  ;;  %v1103_v1 = vpack.c.bf16 %v254_v61, %v252_v59  ;;  %v256_v3 = vld [vmem:[#allocation4 + $0x120] sm:$0xff] }
  0x77   : > { %385 = vmatprep.mubr.f32.mxu0 %v1419_v0  ;;  %1084 = vmatpush1.bf16.msra.mxu0 %v1083_v32  ;;  %v1105_v2 = vpack.c.bf16 %v259_v63, %v257_v62  ;;  %v258_v4 = vld [vmem:[#allocation4 + $0x130] sm:$0xff]  ;;  %v1631_v9 = vld [vmem:[#allocation6] ss:$4 sm:$0x3] }
  0x78   : > { %1086 = vmatprep.subr.bf16.mxu0 %v1085_v35  ;;  %v1107_v5 = vpack.c.bf16 %v258_v4, %v256_v3  ;;  %v1636_v10 = vrot.slane %v1631_v9, %v280_v8 }
  0x79   : > { %1119 = vmatpush1.bf16.msra.mxu1 %v1087_v38 }
  0x7a   : > { %1050 = vmatmul.mubr.msk.f32.gmra.mrb[4].mxu0 %vm284_vm0, %v267_v15  ;;  %1112 = vmatprep.subr.bf16.mxu1 %v1089_v41 }
  0x7b   : > { %391 = vmatprep.mubr.f32.mxu0 %v1419_v0  ;;  %1088 = vmatpush1.bf16.msra.mxu0 %v1087_v38 }
  0x7c   : > { %1090 = vmatprep.subr.bf16.mxu0 %v1089_v41 }
  0x7d   : > { %1120 = vmatpush1.bf16.msra.mxu1 %v1091_v44 }
  0x7e   : > { %1051 = vmatmul.mubr.msk.f32.gmra.mrb[6].mxu0 %vm284_vm0, %v268_v16  ;;  %1113 = vmatprep.subr.bf16.mxu1 %v1093_v47 }
  0x7f   : > { %397 = vmatprep.mubr.f32.mxu0 %v1419_v0  ;;  %1092 = vmatpush1.bf16.msra.mxu0 %v1091_v44 }
  0x80   : > { %1094 = vmatprep.subr.bf16.mxu0 %v1093_v47 }
  0x81   : > { %1121 = vmatpush1.bf16.msra.mxu1 %v1095_v50 }
  0x82   : > { %1052 = vmatmul.mubr.msk.f32.gmra.mrb[8].mxu0 %vm284_vm0, %v269_v17  ;;  %1114 = vmatprep.subr.bf16.mxu1 %v1097_v53 }
  0x83   : > { %403 = vmatprep.mubr.f32.mxu0 %v1419_v0  ;;  %1096 = vmatpush1.bf16.msra.mxu0 %v1095_v50 }
  0x84   : > { %1098 = vmatprep.subr.bf16.mxu0 %v1097_v53 }
  0x85   : > { %1122 = vmatpush1.bf16.msra.mxu1 %v1099_v56 }
  0x86   : > { %1053 = vmatmul.mubr.msk.f32.gmra.mrb[10].mxu0 %vm284_vm0, %v270_v18  ;;  %1115 = vmatprep.subr.bf16.mxu1 %v1101_v60 }
  0x87   : > { %409 = vmatprep.mubr.f32.mxu0 %v1419_v0  ;;  %1100 = vmatpush1.bf16.msra.mxu0 %v1099_v56 }
  0x88   : > { %1102 = vmatprep.subr.bf16.mxu0 %v1101_v60 }
  0x89   : > { %1123 = vmatpush1.bf16.msra.mxu1 %v1103_v1 }
  0x8a   : > { %1054 = vmatmul.mubr.msk.f32.gmra.mrb[12].mxu0 %vm284_vm0, %v271_v19  ;;  %1116 = vmatprep.subr.bf16.mxu1 %v1105_v2 }
  0x8b   : > { %415 = vmatprep.mubr.f32.mxu0 %v1419_v0  ;;  %1104 = vmatpush1.bf16.msra.mxu0 %v1103_v1 }
  0x8c   : > { %1106 = vmatprep.subr.bf16.mxu0 %v1105_v2 }
  0x8d   : > { %1124 = vmatpush1.bf16.msra.mxu1 %v1107_v5 }
  0x8e   : > { %1055 = vmatmul.mubr.msk.f32.gmra.mrb[14].mxu0 %vm284_vm0, %v272_v20 }
  0x8f   : > { %649 = vmatprep.mubr.f32.mxu0 %v1419_v0  ;;  %1108 = vmatpush1.bf16.msra.mxu0 %v1107_v5 }
 0x145   : > { %v1638_v11 = vpop.f32.mrb[0].mxu0 }
 0x146   : > { %v377_v12 = vpop.f32.mrb[1].mxu0 }
 0x147   : > { %v378_v13 = vadd.f32 %v377_v12, %v1636_v10 }
 0x149   : > { %v422_v14 = vrot.slane %v378_v13, 4  ;;  %v1641_v15 = vpop.f32.mrb[2].mxu0 }
 0x14a   : > { %v383_v16 = vpop.f32.mrb[3].mxu0 }
 0x14b   : > { %v423_v17 = vmax.f32 %v378_v13, %v422_v14  ;;  %v384_v18 = vadd.f32 %v383_v16, %v1636_v10 }
 0x14d   : > { %v424_v19 = vrot.slane %v423_v17, 2  ;;  %v428_v20 = vrot.slane %v384_v18, 4  ;;  %v1644_v21 = vpop.f32.mrb[4].mxu0 }
 0x14e   : > { %v389_v22 = vpop.f32.mrb[5].mxu0 }
 0x14f   : > { %v425_v23 = vmax.f32 %v423_v17, %v424_v19  ;;  %v429_v24 = vmax.f32 %v384_v18, %v428_v20  ;;  %v390_v25 = vadd.f32 %v389_v22, %v1636_v10 }
 0x151   : > { %v426_v26 = vrot.slane %v425_v23, 1  ;;  %v430_v27 = vrot.slane %v429_v24, 2  ;;  %v434_v28 = vrot.slane %v390_v25, 4  ;;  %v1647_v29 = vpop.f32.mrb[6].mxu0 }
 0x152   : > { %v395_v30 = vpop.f32.mrb[7].mxu0 }
 0x153   : > { %v427_v31 = vmax.f32 %v425_v23, %v426_v26  ;;  %v431_v32 = vmax.f32 %v429_v24, %v430_v27  ;;  %v435_v33 = vmax.f32 %v390_v25, %v434_v28  ;;  %v396_v34 = vadd.f32 %v395_v30, %v1636_v10 }
 0x155   : > { %v470_v35 = vsub.f32 %v378_v13, %v427_v31  ;;  %v432_v36 = vrot.slane %v431_v32, 1  ;;  %v436_v37 = vrot.slane %v435_v33, 2  ;;  %v440_v38 = vrot.slane %v396_v34, 4  ;;  %v1650_v39 = vpop.f32.mrb[8].mxu0 }
 0x156   : > { %v401_v40 = vpop.f32.mrb[9].mxu0 }
 0x157   : > { %v478_v41 = vmul.f32 1.442695, %v470_v35  ;;  %v433_v42 = vmax.f32 %v431_v32, %v432_v36  ;;  %v437_v43 = vmax.f32 %v435_v33, %v436_v37  ;;  %v441_v44 = vmax.f32 %v396_v34, %v440_v38 }
 0x158   : > { %v402_v45 = vadd.f32 %v401_v40, %v1636_v10 }
 0x159   : > { %1190 = vpow2.f32 %v478_v41  ;;  %v471_v46 = vsub.f32 %v384_v18, %v433_v42  ;;  %v438_v47 = vrot.slane %v437_v43, 1  ;;  %v442_v48 = vrot.slane %v441_v44, 2  ;;  %v1653_v49 = vpop.f32.mrb[10].mxu0 }
 0x15a   : > { %v446_v50 = vrot.slane %v402_v45, 4  ;;  %v407_v51 = vpop.f32.mrb[11].mxu0 }
 0x15b   : > { %v480_v52 = vmul.f32 1.442695, %v471_v46  ;;  %v439_v53 = vmax.f32 %v437_v43, %v438_v47  ;;  %v443_v54 = vmax.f32 %v441_v44, %v442_v48  ;;  %v408_v55 = vadd.f32 %v407_v51, %v1636_v10 }
 0x15c   : > { %v447_v56 = vmax.f32 %v402_v45, %v446_v50 }
 0x15d   : > { %1192 = vpow2.f32 %v480_v52  ;;  %v472_v57 = vsub.f32 %v390_v25, %v439_v53  ;;  %v444_v58 = vrot.slane %v443_v54, 1  ;;  %v452_v59 = vrot.slane %v408_v55, 4  ;;  %v1656_v60 = vpop.f32.mrb[12].mxu0 }
 0x15e   : > { %v448_v61 = vrot.slane %v447_v56, 2  ;;  %v413_v62 = vpop.f32.mrb[13].mxu0 }
 0x15f   : > { %v482_v63 = vmul.f32 1.442695, %v472_v57  ;;  %v445_v1 = vmax.f32 %v443_v54, %v444_v58  ;;  %v453_v2 = vmax.f32 %v408_v55, %v452_v59  ;;  %v414_v3 = vadd.f32 %v413_v62, %v1636_v10 }
 0x160   : > { %v449_v4 = vmax.f32 %v447_v56, %v448_v61 }
 0x161   : > { %1194 = vpow2.f32 %v482_v63  ;;  %v473_v5 = vsub.f32 %v396_v34, %v445_v1  ;;  %v454_v6 = vrot.slane %v453_v2, 2  ;;  %v458_v12 = vrot.slane %v414_v3, 4  ;;  %v1659_v13 = vpop.f32.mrb[14].mxu0 }
 0x162   : > { %v450_v14 = vrot.slane %v449_v4, 1  ;;  %v419_v16 = vpop.f32.mrb[15].mxu0 }
 0x163   : > { %v1661_v17 = vpop.eup %1190  ;;  %v484_v18 = vmul.f32 1.442695, %v473_v5  ;;  %v455_v19 = vmax.f32 %v453_v2, %v454_v6  ;;  %v459_v20 = vmax.f32 %v414_v3, %v458_v12  ;;  %v420_v22 = vadd.f32 %v419_v16, %v1636_v10 }
 0x164   : > { %v494_v23 = vrot.slane %v1661_v17, 4  ;;  %v451_v24 = vmax.f32 %v449_v4, %v450_v14  ;;  %v276_v4 = vsub.s32 0, %v1628_v7 }
 0x165   : > { %1196 = vpow2.f32 %v484_v18  ;;  %v456_v25 = vrot.slane %v455_v19, 1  ;;  %v460_v26 = vrot.slane %v459_v20, 2  ;;  %v464_v27 = vrot.slane %v420_v22, 4 }
 0x166   : > { %v474_v28 = vsub.f32 %v402_v45, %v451_v24  ;;  %v495_v30 = vadd.f32 %v1661_v17, %v494_v23 }
 0x167   : > { %v1666_v31 = vpop.eup %1192  ;;  %v457_v32 = vmax.f32 %v455_v19, %v456_v25  ;;  %v461_v33 = vmax.f32 %v459_v20, %v460_v26  ;;  %v465_v34 = vmax.f32 %v420_v22, %v464_v27 }
 0x168   : > { %v486_v35 = vmul.f32 1.442695, %v474_v28  ;;  %v496_v36 = vrot.slane %v495_v30, 2  ;;  %v500_v37 = vrot.slane %v1666_v31, 4 }
 0x169   : > { %v475_v10 = vsub.f32 %v408_v55, %v457_v32  ;;  %v462_v38 = vrot.slane %v461_v33, 1  ;;  %v466_v40 = vrot.slane %v465_v34, 2 }
 0x16a   : > { %1198 = vpow2.f32 %v486_v35  ;;  %v497_v41 = vadd.f32 %v496_v36, %v495_v30  ;;  %v501_v42 = vadd.f32 %v1666_v31, %v500_v37 }
 0x16b   : > { %v1670_v43 = vpop.eup %1194  ;;  %v488_v44 = vmul.f32 1.442695, %v475_v10  ;;  %v463_v45 = vmax.f32 %v461_v33, %v462_v38  ;;  %v467_v46 = vmax.f32 %v465_v34, %v466_v40 }
 0x16c   : > { %v498_v47 = vrot.slane %v497_v41, 1  ;;  %v502_v48 = vrot.slane %v501_v42, 2  ;;  %v506_v50 = vrot.slane %v1670_v43, 4 }
 0x16d   : > { %1200 = vpow2.f32 %v488_v44  ;;  %v476_v51 = vsub.f32 %v414_v3, %v463_v45  ;;  %v468_v52 = vrot.slane %v467_v46, 1 }
 0x16e   : > { %v499_v53 = vadd.f32 %v498_v47, %v497_v41  ;;  %v503_v54 = vadd.f32 %v502_v48, %v501_v42  ;;  %v507_v55 = vadd.f32 %v1670_v43, %v506_v50 }
 0x16f   : > { %v1674_v56 = vpop.eup %1196  ;;  %v490_v57 = vmul.f32 1.442695, %v476_v51  ;;  %v469_v58 = vmax.f32 %v467_v46, %v468_v52 }
 0x170   : > { %1202 = vrcp.f32 %v499_v53  ;;  %v504_v59 = vrot.slane %v503_v54, 1  ;;  %v508_v61 = vrot.slane %v507_v55, 2  ;;  %v512_v62 = vrot.slane %v1674_v56, 4 }
 0x171   : > { %1204 = vpow2.f32 %v490_v57  ;;  %v477_v63 = vsub.f32 %v420_v22, %v469_v58  ;;  %v1687_v22 = vrot.slane %v1631_v9, %v276_v4 }
 0x172   : > { %v505_v1 = vadd.f32 %v504_v59, %v503_v54  ;;  %v509_v2 = vadd.f32 %v508_v61, %v507_v55  ;;  %v513_v3 = vadd.f32 %v1674_v56, %v512_v62 }
 0x173   : > { %v492_v5 = vmul.f32 1.442695, %v477_v63  ;;  %v376_v33 = vadd.f32 %v1638_v11, %v1687_v22  ;;  %v382_v44 = vadd.f32 %v1641_v15, %v1687_v22  ;;  %v388_v55 = vadd.f32 %v1644_v21, %v1687_v22 }
 0x174   : > { %v1679_v6 = vpop.eup %1198  ;;  %1206 = vrcp.f32 %v505_v1  ;;  %v510_v12 = vrot.slane %v509_v2, 1  ;;  %v514_v14 = vrot.slane %v513_v3, 2  ;;  %v394_v1 = vadd.f32 %v1647_v29, %v1687_v22 }
 0x175   : > { %1208 = vpow2.f32 %v492_v5  ;;  %v518_v16 = vrot.slane %v1679_v6, 4 }
 0x176   : > { %v511_v18 = vadd.f32 %v510_v12, %v509_v2  ;;  %v515_v19 = vadd.f32 %v514_v14, %v513_v3 }
 0x177   : > { %v1682_v20 = vpop.eup %1200  ;;  %v519_v23 = vadd.f32 %v1679_v6, %v518_v16  ;;  %v400_v16 = vadd.f32 %v1650_v39, %v1687_v22  ;;  %v412_v39 = vadd.f32 %v1656_v60, %v1687_v22 }
 0x178   : > { %1210 = vrcp.f32 %v511_v18  ;;  %v516_v24 = vrot.slane %v515_v19, 1  ;;  %v524_v25 = vrot.slane %v1682_v20, 4 }
 0x179   : > { %v520_v26 = vrot.slane %v519_v23, 2 }
 0x17a   : > { %v1203_v27 = vpop.eup %1202  ;;  %v517_v28 = vadd.f32 %v516_v24, %v515_v19  ;;  %v525_v30 = vadd.f32 %v1682_v20, %v524_v25 }
 0x17b   : > { %v1692_v32 = vpop.eup %1204  ;;  %v543_v34 = vmul.f32 %v1203_v27, %v1661_v17  ;;  %v521_v9 = vadd.f32 %v520_v26, %v519_v23 }
 0x17c   : > { %1212 = vrcp.f32 %v517_v28  ;;  %v526_v35 = vrot.slane %v525_v30, 2  ;;  %v530_v36 = vrot.slane %v1692_v32, 4 }
 0x17d   : > { %v558_v37 = vmul.f32 %v543_v34, %v376_v33  ;;  %v522_v10 = vrot.slane %v521_v9, 1 }
 0x17e   : > { %v1207_v38 = vpop.eup %1206  ;;  %v527_v40 = vadd.f32 %v526_v35, %v525_v30  ;;  %v531_v41 = vadd.f32 %v1692_v32, %v530_v36 }
 0x17f   : > { %v1209_v42 = vpop.eup %1208  ;;  %v566_v45 = vmax.f32 %v558_v37, 0.0  ;;  %v545_v11 = vmul.f32 %v1207_v38, %v1666_v31  ;;  %v523_v46 = vadd.f32 %v522_v10, %v521_v9  ;;  %v1725_v9 = vld [vmem:[#allocation6 + $0x1] ss:$4 sm:$0x3] }
 0x180   : > { %v528_v17 = vrot.slane %v527_v40, 1  ;;  %v532_v47 = vrot.slane %v531_v41, 2  ;;  %v536_v48 = vrot.slane %v1209_v42, 4 }
 0x181   : > { %650 = vmatmul.mubr.f32.vlgmr.msra.gmra.mrb[16].mxu0 %v566_v45  ;;  %v559_v50 = vmul.f32 %v545_v11, %v382_v44  ;;  %1214 = vrcp.f32 %v523_v46 }
 0x182   : > { %v1211_v51 = vpop.eup %1210  ;;  %655 = vmatprep.mubr.f32.mxu0 %v1419_v0  ;;  %v529_v52 = vadd.f32 %v528_v17, %v527_v40  ;;  %v533_v53 = vadd.f32 %v532_v47, %v531_v41  ;;  %v537_v54 = vadd.f32 %v1209_v42, %v536_v48 }
 0x183   : > { %v567_v15 = vmax.f32 %v559_v50, 0.0  ;;  %v547_v57 = vmul.f32 %v1211_v51, %v1670_v43 }
 0x184   : > { %1216 = vrcp.f32 %v529_v52  ;;  %v534_v31 = vrot.slane %v533_v53, 1  ;;  %v538_v58 = vrot.slane %v537_v54, 2 }
 0x185   : > { %656 = vmatmul.mubr.f32.gmra.mrb[18].mxu0 %v567_v15  ;;  %v560_v59 = vmul.f32 %v547_v57, %v388_v55 }
 0x186   : > { %v1213_v61 = vpop.eup %1212  ;;  %661 = vmatprep.mubr.f32.mxu0 %v1419_v0  ;;  %v535_v62 = vadd.f32 %v534_v31, %v533_v53  ;;  %v539_v63 = vadd.f32 %v538_v58, %v537_v54 }
 0x187   : > { %v568_v2 = vmax.f32 %v560_v59, 0.0  ;;  %v549_v3 = vmul.f32 %v1213_v61, %v1674_v56  ;;  %v406_v56 = vadd.f32 %v1653_v49, %v1687_v22  ;;  %v418_v49 = vadd.f32 %v1659_v13, %v1687_v22 }
 0x188   : > { %1218 = vrcp.f32 %v535_v62  ;;  %v540_v21 = vrot.slane %v539_v63, 1 }
 0x189   : > { %662 = vmatmul.mubr.f32.gmra.mrb[20].mxu0 %v568_v2  ;;  %v561_v43 = vmul.f32 %v549_v3, %v394_v1 }
 0x18a   : > { %v541_v5 = vadd.f32 %v540_v21, %v539_v63 }
 0x18b   : > { %v1215_v12 = vpop.eup %1214  ;;  %v569_v14 = vmax.f32 %v561_v43, 0.0 }
 0x18c   : > { %v551_v18 = vmul.f32 %v1215_v12, %v1679_v6  ;;  %1220 = vrcp.f32 %v541_v5 }
 0x18d   : > { %668 = vmatmul.mubr.f32.vlgmr.msra.gmra.mrb[0].mxu1 %v569_v14 }
 0x18e   : > { %v1217_v19 = vpop.eup %1216  ;;  %673 = vmatprep.mubr.f32.mxu1 %v1419_v0  ;;  %v562_v29 = vmul.f32 %v551_v18, %v400_v16 }
 0x18f   : > { %v553_v23 = vmul.f32 %v1217_v19, %v1682_v20 }
 0x190   : > { %v570_v24 = vmax.f32 %v562_v29, 0.0 }
 0x191   : > { %v563_v25 = vmul.f32 %v553_v23, %v406_v56 }
 0x192   : > { %v1219_v26 = vpop.eup %1218  ;;  %674 = vmatmul.mubr.f32.gmra.mrb[2].mxu1 %v570_v24 }
 0x193   : > { %679 = vmatprep.mubr.f32.mxu1 %v1419_v0  ;;  %v571_v6 = vmax.f32 %v563_v25, 0.0  ;;  %v555_v27 = vmul.f32 %v1219_v26, %v1692_v32  ;;  %v1730_v32 = vrot.slane %v1725_v9, %v280_v8 }
 0x195   : > { %v564_v28 = vmul.f32 %v555_v27, %v412_v39 }
 0x196   : > { %v1221_v30 = vpop.eup %1220  ;;  %680 = vmatmul.mubr.f32.gmra.mrb[4].mxu1 %v571_v6 }
 0x197   : > { %685 = vmatprep.mubr.f32.mxu1 %v1419_v0  ;;  %v572_v20 = vmax.f32 %v564_v28, 0.0  ;;  %v557_v33 = vmul.f32 %v1221_v30, %v1209_v42 }
 0x199   : > { %v565_v34 = vmul.f32 %v557_v33, %v418_v49 }
 0x19a   : > { %686 = vmatmul.mubr.f32.gmra.mrb[6].mxu1 %v572_v20 }
 0x19b   : > { %691 = vmatprep.mubr.f32.mxu1 %v1419_v0  ;;  %v573_v60 = vmax.f32 %v565_v34, 0.0 }
 0x19e   : > { %692 = vmatmul.mubr.f32.gmra.mrb[8].mxu1 %v573_v60 }
 0x254   : > { %v1732_v35 = vpop.f32.mrb[16].mxu0 }
 0x255   : > { %v653_v13 = vpop.f32.mrb[17].mxu0 }
 0x256   : > { %v654_v22 = vadd.f32 %v653_v13, %v1730_v32 }
 0x258   : > { %v698_v36 = vrot.slane %v654_v22, 4  ;;  %v1735_v37 = vpop.f32.mrb[18].mxu0 }
 0x259   : > { %v659_v10 = vpop.f32.mrb[19].mxu0 }
 0x25a   : > { %v699_v38 = vmax.f32 %v654_v22, %v698_v36  ;;  %v660_v0 = vadd.f32 %v659_v10, %v1730_v32 }
 0x25c   : > { %v700_v40 = vrot.slane %v699_v38, 2  ;;  %v704_v41 = vrot.slane %v660_v0, 4  ;;  %v1738_v42 = vpop.f32.mrb[20].mxu0 }
 0x25d   : > { %v665_v44 = vpop.f32.mrb[21].mxu0 }
 0x25e   : > { %v701_v45 = vmax.f32 %v699_v38, %v700_v40  ;;  %v705_v8 = vmax.f32 %v660_v0, %v704_v41  ;;  %v666_v11 = vadd.f32 %v665_v44, %v1730_v32 }
 0x260   : > { %v702_v46 = vrot.slane %v701_v45, 1  ;;  %v706_v17 = vrot.slane %v705_v8, 2  ;;  %v710_v47 = vrot.slane %v666_v11, 4  ;;  %v1741_v48 = vpop.f32.mrb[0].mxu1 }
 0x261   : > { %v671_v50 = vpop.f32.mrb[1].mxu1 }
 0x262   : > { %v703_v51 = vmax.f32 %v701_v45, %v702_v46  ;;  %v707_v52 = vmax.f32 %v705_v8, %v706_v17  ;;  %v711_v53 = vmax.f32 %v666_v11, %v710_v47  ;;  %v672_v54 = vadd.f32 %v671_v50, %v1730_v32 }
 0x264   : > { %v746_v55 = vsub.f32 %v654_v22, %v703_v51  ;;  %v708_v15 = vrot.slane %v707_v52, 1  ;;  %v712_v57 = vrot.slane %v711_v53, 2  ;;  %v716_v31 = vrot.slane %v672_v54, 4 }
 0x265   : > { %v1744_v58 = vpop.f32.mrb[2].mxu1 }
 0x266   : > { %v754_v59 = vmul.f32 1.442695, %v746_v55  ;;  %v709_v61 = vmax.f32 %v707_v52, %v708_v15  ;;  %v713_v62 = vmax.f32 %v711_v53, %v712_v57  ;;  %v717_v63 = vmax.f32 %v672_v54, %v716_v31  ;;  %v677_v1 = vpop.f32.mrb[3].mxu1 }
 0x267   : > { %v678_v2 = vadd.f32 %v677_v1, %v1730_v32 }
 0x268   : > { %1222 = vpow2.f32 %v754_v59  ;;  %v747_v3 = vsub.f32 %v660_v0, %v709_v61  ;;  %v714_v21 = vrot.slane %v713_v62, 1  ;;  %v718_v43 = vrot.slane %v717_v63, 2 }
 0x269   : > { %v722_v5 = vrot.slane %v678_v2, 4  ;;  %v1747_v12 = vpop.f32.mrb[4].mxu1 }
 0x26a   : > { %v756_v14 = vmul.f32 1.442695, %v747_v3  ;;  %v715_v16 = vmax.f32 %v713_v62, %v714_v21  ;;  %v719_v18 = vmax.f32 %v717_v63, %v718_v43  ;;  %v683_v19 = vpop.f32.mrb[5].mxu1 }
 0x26b   : > { %v723_v29 = vmax.f32 %v678_v2, %v722_v5  ;;  %v684_v56 = vadd.f32 %v683_v19, %v1730_v32 }
 0x26c   : > { %1224 = vpow2.f32 %v756_v14  ;;  %v748_v23 = vsub.f32 %v666_v11, %v715_v16  ;;  %v720_v24 = vrot.slane %v719_v18, 1 }
 0x26d   : > { %v724_v25 = vrot.slane %v723_v29, 2  ;;  %v728_v26 = vrot.slane %v684_v56, 4  ;;  %v1750_v39 = vpop.f32.mrb[6].mxu1 }
 0x26e   : > { %v758_v6 = vmul.f32 1.442695, %v748_v23  ;;  %v721_v27 = vmax.f32 %v719_v18, %v720_v24  ;;  %v689_v28 = vpop.f32.mrb[7].mxu1 }
 0x26f   : > { %v725_v30 = vmax.f32 %v723_v29, %v724_v25  ;;  %v729_v49 = vmax.f32 %v684_v56, %v728_v26  ;;  %v690_v20 = vadd.f32 %v689_v28, %v1730_v32 }
 0x270   : > { %1226 = vpow2.f32 %v758_v6  ;;  %v749_v33 = vsub.f32 %v672_v54, %v721_v27 }
 0x271   : > { %v726_v34 = vrot.slane %v725_v30, 1  ;;  %v730_v60 = vrot.slane %v729_v49, 2  ;;  %v734_v13 = vrot.slane %v690_v20, 4  ;;  %v1753_v22 = vpop.f32.mrb[8].mxu1 }
 0x272   : > { %v1755_v36 = vpop.eup %1222  ;;  %v760_v10 = vmul.f32 1.442695, %v749_v33  ;;  %v695_v38 = vpop.f32.mrb[9].mxu1 }
 0x273   : > { %v727_v0 = vmax.f32 %v725_v30, %v726_v34  ;;  %v731_v40 = vmax.f32 %v729_v49, %v730_v60  ;;  %v735_v41 = vmax.f32 %v690_v20, %v734_v13  ;;  %v696_v44 = vadd.f32 %v695_v38, %v1730_v32 }
 0x274   : > { %1228 = vpow2.f32 %v760_v10  ;;  %v770_v45 = vrot.slane %v1755_v36, 4 }
 0x275   : > { %v750_v8 = vsub.f32 %v678_v2, %v727_v0  ;;  %v732_v11 = vrot.slane %v731_v40, 1  ;;  %v736_v46 = vrot.slane %v735_v41, 2  ;;  %v740_v17 = vrot.slane %v696_v44, 4 }
 0x276   : > { %v1759_v47 = vpop.eup %1224  ;;  %v771_v50 = vadd.f32 %v1755_v36, %v770_v45 }
 0x277   : > { %v762_v51 = vmul.f32 1.442695, %v750_v8  ;;  %v733_v52 = vmax.f32 %v731_v40, %v732_v11  ;;  %v737_v53 = vmax.f32 %v735_v41, %v736_v46  ;;  %v741_v54 = vmax.f32 %v696_v44, %v740_v17 }
 0x278   : > { %v772_v55 = vrot.slane %v771_v50, 2  ;;  %v776_v15 = vrot.slane %v1759_v47, 4  ;;  %v1781_v40 = vrot.slane %v1725_v9, %v276_v4 }
 0x279   : > { %1230 = vpow2.f32 %v762_v51  ;;  %v751_v32 = vsub.f32 %v684_v56, %v733_v52  ;;  %v738_v57 = vrot.slane %v737_v53, 1  ;;  %v742_v31 = vrot.slane %v741_v54, 2 }
 0x27a   : > { %v1763_v59 = vpop.eup %1226  ;;  %v773_v61 = vadd.f32 %v772_v55, %v771_v50  ;;  %v777_v62 = vadd.f32 %v1759_v47, %v776_v15  ;;  %v652_v51 = vadd.f32 %v1732_v35, %v1781_v40  ;;  %v1791_v55 = vld [vmem:[#allocation6 + $0x2] ss:$0 sm:$0xff] }
 0x27b   : > { %v764_v63 = vmul.f32 1.442695, %v751_v32  ;;  %v739_v1 = vmax.f32 %v737_v53, %v738_v57  ;;  %v743_v2 = vmax.f32 %v741_v54, %v742_v31  ;;  %v782_v3 = vrot.slane %v1763_v59, 4 }
 0x27c   : > { %v774_v21 = vrot.slane %v773_v61, 1  ;;  %v778_v43 = vrot.slane %v777_v62, 2 }
 0x27d   : > { %1232 = vpow2.f32 %v764_v63  ;;  %v752_v5 = vsub.f32 %v690_v20, %v739_v1  ;;  %v744_v14 = vrot.slane %v743_v2, 1  ;;  %v783_v16 = vadd.f32 %v1763_v59, %v782_v3 }
 0x27e   : > { %v1768_v18 = vpop.eup %1228  ;;  %v775_v19 = vadd.f32 %v774_v21, %v773_v61  ;;  %v779_v29 = vadd.f32 %v778_v43, %v777_v62  ;;  %v658_v61 = vadd.f32 %v1735_v37, %v1781_v40  ;;  %v664_v3 = vadd.f32 %v1738_v42, %v1781_v40 }
 0x27f   : > { %v766_v56 = vmul.f32 1.442695, %v752_v5  ;;  %v745_v23 = vmax.f32 %v743_v2, %v744_v14  ;;  %v784_v24 = vrot.slane %v783_v16, 2  ;;  %v788_v25 = vrot.slane %v1768_v18, 4 }
 0x280   : > { %1234 = vrcp.f32 %v775_v19  ;;  %v780_v26 = vrot.slane %v779_v29, 1 }
 0x281   : > { %1236 = vpow2.f32 %v766_v56  ;;  %v753_v6 = vsub.f32 %v696_v44, %v745_v23  ;;  %v785_v27 = vadd.f32 %v784_v24, %v783_v16  ;;  %v789_v28 = vadd.f32 %v1768_v18, %v788_v25 }
 0x282   : > { %v781_v30 = vadd.f32 %v780_v26, %v779_v29  ;;  %v670_v24 = vadd.f32 %v1741_v48, %v1781_v40  ;;  %v676_v48 = vadd.f32 %v1744_v58, %v1781_v40  ;;  %v688_v58 = vadd.f32 %v1750_v39, %v1781_v40 }
 0x283   : > { %v1772_v49 = vpop.eup %1230  ;;  %v768_v20 = vmul.f32 1.442695, %v753_v6  ;;  %v786_v33 = vrot.slane %v785_v27, 1  ;;  %v790_v34 = vrot.slane %v789_v28, 2 }
 0x284   : > { %1238 = vrcp.f32 %v781_v30  ;;  %v794_v60 = vrot.slane %v1772_v49, 4 }
 0x285   : > { %1240 = vpow2.f32 %v768_v20  ;;  %v787_v13 = vadd.f32 %v786_v33, %v785_v27  ;;  %v791_v10 = vadd.f32 %v790_v34, %v789_v28 }
 0x286   : > { %v795_v38 = vadd.f32 %v1772_v49, %v794_v60 }
 0x287   : > { %v1776_v0 = vpop.eup %1232  ;;  %1242 = vrcp.f32 %v787_v13  ;;  %v792_v41 = vrot.slane %v791_v10, 1 }
 0x288   : > { %v796_v44 = vrot.slane %v795_v38, 2  ;;  %v800_v45 = vrot.slane %v1776_v0, 4 }
 0x289   : > { %v793_v8 = vadd.f32 %v792_v41, %v791_v10 }
 0x28a   : > { %v1235_v11 = vpop.eup %1234  ;;  %v797_v46 = vadd.f32 %v796_v44, %v795_v38  ;;  %v801_v17 = vadd.f32 %v1776_v0, %v800_v45  ;;  %v682_v38 = vadd.f32 %v1747_v12, %v1781_v40  ;;  %v694_v12 = vadd.f32 %v1753_v22, %v1781_v40 }
 0x28b   : > { %v1785_v50 = vpop.eup %1236  ;;  %v819_v7 = vmul.f32 %v1235_v11, %v1755_v36  ;;  %1244 = vrcp.f32 %v793_v8 }
 0x28c   : > { %v798_v4 = vrot.slane %v797_v46, 1  ;;  %v802_v9 = vrot.slane %v801_v17, 2  ;;  %v806_v52 = vrot.slane %v1785_v50, 4 }
 0x28d   : > { %v834_v53 = vmul.f32 %v819_v7, %v652_v51 }
 0x28e   : > { %v1239_v54 = vpop.eup %1238  ;;  %v799_v15 = vadd.f32 %v798_v4, %v797_v46  ;;  %v803_v32 = vadd.f32 %v802_v9, %v801_v17  ;;  %v807_v57 = vadd.f32 %v1785_v50, %v806_v52 }
 0x28f   : > { %v1241_v31 = vpop.eup %1240  ;;  %v842_v35 = vmax.f32 %v834_v53, 0.0  ;;  %v821_v36 = vmul.f32 %v1239_v54, %v1759_v47 }
 0x290   : > { %1246 = vrcp.f32 %v799_v15  ;;  %v804_v62 = vrot.slane %v803_v32, 1  ;;  %v808_v63 = vrot.slane %v807_v57, 2  ;;  %v812_v1 = vrot.slane %v1241_v31, 4 }
 0x291   : > { %v1243_v2 = vpop.eup %1242  ;;  %v854_v21 = vmul.f32 %v1791_v55, %v842_v35  ;;  %v835_v43 = vmul.f32 %v821_v36, %v658_v61 }
 0x292   : > { %v823_v5 = vmul.f32 %v1243_v2, %v1763_v59  ;;  %v805_v14 = vadd.f32 %v804_v62, %v803_v32  ;;  %v809_v16 = vadd.f32 %v808_v63, %v807_v57  ;;  %v813_v19 = vadd.f32 %v1241_v31, %v812_v1 }
 0x293   : > { %862 = vadd.xlane.f32.xlu0 %v854_v21  ;;  %v843_v37 = vmax.f32 %v835_v43, 0.0 }
 0x294   : > { %v836_v29 = vmul.f32 %v823_v5, %v664_v3  ;;  %1248 = vrcp.f32 %v805_v14  ;;  %v810_v47 = vrot.slane %v809_v16, 1  ;;  %v814_v56 = vrot.slane %v813_v19, 2 }
 0x295   : > { %v1245_v23 = vpop.eup %1244  ;;  %v855_v42 = vmul.f32 %v1791_v55, %v843_v37 }
 0x296   : > { %v844_v25 = vmax.f32 %v836_v29, 0.0  ;;  %v825_v26 = vmul.f32 %v1245_v23, %v1768_v18  ;;  %v811_v6 = vadd.f32 %v810_v47, %v809_v16  ;;  %v815_v59 = vadd.f32 %v814_v56, %v813_v19 }
 0x297   : > { %864 = vadd.xlane.f32.xlu0 %v855_v42 }
 0x298   : > { %v856_v27 = vmul.f32 %v1791_v55, %v844_v25  ;;  %v837_v28 = vmul.f32 %v825_v26, %v670_v24  ;;  %1250 = vrcp.f32 %v811_v6  ;;  %v816_v30 = vrot.slane %v815_v59, 1 }
 0x29a   : > { %v1247_v20 = vpop.eup %1246  ;;  %866 = vadd.xlane.f32.xlu1 %v856_v27  ;;  %v845_v33 = vmax.f32 %v837_v28, 0.0  ;;  %v817_v34 = vadd.f32 %v816_v30, %v815_v59 }
 0x29b   : > { %v827_v60 = vmul.f32 %v1247_v20, %v1772_v49 }
 0x29c   : > { %v857_v13 = vmul.f32 %v1791_v55, %v845_v33  ;;  %1252 = vrcp.f32 %v817_v34 }
 0x29d   : > { %v838_v18 = vmul.f32 %v827_v60, %v676_v48 }
 0x29e   : > { %v1249_v10 = vpop.eup %1248  ;;  %868 = vadd.xlane.f32.xlu1 %v857_v13 }
 0x29f   : > { %v846_v41 = vmax.f32 %v838_v18, 0.0  ;;  %v829_v44 = vmul.f32 %v1249_v10, %v1776_v0 }
 0x2a1   : > { %v858_v45 = vmul.f32 %v1791_v55, %v846_v41  ;;  %v839_v8 = vmul.f32 %v829_v44, %v682_v38 }
 0x2a2   : > { %v1251_v11 = vpop.eup %1250 }
 0x2a3   : > { %870 = vadd.xlane.f32.xlu0 %v858_v45  ;;  %v847_v49 = vmax.f32 %v839_v8, 0.0  ;;  %v831_v46 = vmul.f32 %v1251_v11, %v1785_v50  ;;  %v1057_v50 = vld [vmem:[#allocation6 + $0x3] ss:$0 sm:$0xff] }
 0x2a5   : > { %v859_v17 = vmul.f32 %v1791_v55, %v847_v49  ;;  %v840_v51 = vmul.f32 %v831_v46, %v688_v58 }
 0x2a6   : > { %v1253_v7 = vpop.eup %1252 }
 0x2a7   : > { %872 = vadd.xlane.f32.xlu1 %v859_v17  ;;  %v848_v0 = vmax.f32 %v840_v51, 0.0  ;;  %v833_v4 = vmul.f32 %v1253_v7, %v1241_v31 }
 0x2a9   : > { %v860_v9 = vmul.f32 %v1791_v55, %v848_v0  ;;  %v841_v52 = vmul.f32 %v833_v4, %v694_v12 }
 0x2ab   : > { %874 = vadd.xlane.f32.xlu0 %v860_v9  ;;  %v849_v53 = vmax.f32 %v841_v52, 0.0 }
 0x2ad   : > { %v861_v39 = vmul.f32 %v1791_v55, %v849_v53 }
 0x2af   : > { %876 = vadd.xlane.f32.xlu1 %v861_v39 }
 0x320   : > { %v863_v54 = vpop.xlane.xlu0 %862 }
 0x321   : > { %v882_v15 = vadd.f32 %v1057_v50, %v863_v54 }
 0x323   : > { %v1058_v32 = vmul.f32 -1.442695, %v882_v15 }
 0x324   : > { %v865_v57 = vpop.xlane.xlu0 %864 }
 0x325   : > { %1254 = vpow2.f32 %v1058_v32  ;;  %v883_v61 = vadd.f32 %v1057_v50, %v865_v57 }
 0x327   : > { %v1059_v22 = vmul.f32 -1.442695, %v883_v61  ;;  %v867_v40 = vpop.xlane.xlu1 %866 }
 0x328   : > { %v884_v35 = vadd.f32 %v1057_v50, %v867_v40 }
 0x329   : > { %1256 = vpow2.f32 %v1059_v22 }
 0x32a   : > { %v1060_v31 = vmul.f32 -1.442695, %v884_v35 }
 0x32b   : > { %v869_v36 = vpop.xlane.xlu1 %868 }
 0x32c   : > { %1258 = vpow2.f32 %v1060_v31  ;;  %v885_v62 = vadd.f32 %v1057_v50, %v869_v36 }
 0x32e   : > { %v1061_v63 = vmul.f32 -1.442695, %v885_v62 }
 0x32f   : > { %v1255_v55 = vpop.eup %1254 }
 0x330   : > { %v914_v1 = vadd.f32 1.0, %v1255_v55  ;;  %1260 = vpow2.f32 %v1061_v63  ;;  %v871_v2 = vpop.xlane.xlu0 %870 }
 0x331   : > { %v886_v3 = vadd.f32 %v1057_v50, %v871_v2 }
 0x332   : > { %1262 = vrcp.f32 %v914_v1 }
 0x333   : > { %v1257_v21 = vpop.eup %1256  ;;  %v1062_v43 = vmul.f32 -1.442695, %v886_v3 }
 0x334   : > { %v915_v5 = vadd.f32 1.0, %v1257_v21  ;;  %v873_v14 = vpop.xlane.xlu1 %872 }
 0x335   : > { %1264 = vpow2.f32 %v1062_v43  ;;  %v887_v16 = vadd.f32 %v1057_v50, %v873_v14 }
 0x336   : > { %v1259_v19 = vpop.eup %1258  ;;  %1266 = vrcp.f32 %v915_v5 }
 0x337   : > { %v916_v37 = vadd.f32 1.0, %v1259_v19  ;;  %v1063_v29 = vmul.f32 -1.442695, %v887_v16 }
 0x338   : > { %v875_v47 = vpop.xlane.xlu0 %874 }
 0x339   : > { %1268 = vrcp.f32 %v916_v37  ;;  %v888_v56 = vadd.f32 %v1057_v50, %v875_v47 }
 0x33a   : > { %v1261_v23 = vpop.eup %1260  ;;  %1270 = vpow2.f32 %v1063_v29 }
 0x33b   : > { %v917_v24 = vadd.f32 1.0, %v1261_v23  ;;  %v1064_v42 = vmul.f32 -1.442695, %v888_v56 }
 0x33c   : > { %v1263_v25 = vpop.eup %1262  ;;  %v877_v26 = vpop.xlane.xlu1 %876 }
 0x33d   : > { %939 = vst.msk [vmem:[%s1827_s19] sm:$0xff] %vm938_vm1, %v1263_v25  ;;  %1272 = vrcp.f32 %v917_v24  ;;  %v889_v6 = vadd.f32 %v1057_v50, %v877_v26 }
 0x33e   : > { %1274 = vpow2.f32 %v1064_v42 }
 0x33f   : > { %v1265_v59 = vpop.eup %1264  ;;  %v1065_v27 = vmul.f32 -1.442695, %v889_v6 }
 0x340   : > { %v1267_v28 = vpop.eup %1266  ;;  %v918_v30 = vadd.f32 1.0, %v1265_v59 }
 0x341   : > { %940 = vst.msk [vmem:[%s1827_s19 + $0x8] sm:$0xff] %vm938_vm1, %v1267_v28  ;;  %1276 = vpow2.f32 %v1065_v27 }
 0x342   : > { %1278 = vrcp.f32 %v918_v30 }
 0x343   : > { %v1269_v20 = vpop.eup %1268 }
 0x344   : > { %v1271_v33 = vpop.eup %1270  ;;  %941 = vst.msk [vmem:[%s1827_s19 + $0x10] sm:$0xff] %vm938_vm1, %v1269_v20 }
 0x345   : > { %v919_v34 = vadd.f32 1.0, %v1271_v33 }
 0x347   : > { %v1273_v48 = vpop.eup %1272  ;;  %1280 = vrcp.f32 %v919_v34 }
 0x348   : > { %v1275_v60 = vpop.eup %1274  ;;  %942 = vst.msk [vmem:[%s1827_s19 + $0x18] sm:$0xff] %vm938_vm1, %v1273_v48 }
 0x349   : > { %v920_v13 = vadd.f32 1.0, %v1275_v60 }
 0x34b   : > { %v1277_v18 = vpop.eup %1276  ;;  %1282 = vrcp.f32 %v920_v13 }
 0x34c   : > { %v1279_v10 = vpop.eup %1278  ;;  %v921_v38 = vadd.f32 1.0, %v1277_v18 }
 0x34d   : > { %943 = vst.msk [vmem:[%s1827_s19 + $0x20] sm:$0xff] %vm938_vm1, %v1279_v10 }
 0x34e   : > { %1284 = vrcp.f32 %v921_v38 }
 0x351   : > { %v1281_v41 = vpop.eup %1280 }
 0x352   : > { %944 = vst.msk [vmem:[%s1827_s19 + $0x28] sm:$0xff] %vm938_vm1, %v1281_v41 }
 0x355   : > { %v1283_v44 = vpop.eup %1282 }
 0x356   : > { %945 = vst.msk [vmem:[%s1827_s19 + $0x30] sm:$0xff] %vm938_vm1, %v1283_v44 }
 0x358   : > { %v1285_v45 = vpop.eup %1284 }
 0x359   : > { %946 = vst.msk [vmem:[%s1827_s19 + $0x38] sm:$0xff] %vm938_vm1, %v1285_v45 }
 0x35a PF: > { %p14_p6 = scmp.ge.s32.totalorder %s1536_s29, 4   ;;  %s1874_s12 = smov %s1402_s13 }
 0x35b   : > { %s1875_s13 = smov %s1406_s14  ;;  %s1876_s14 = smov %s1547_s5 }
 0x35c   : > { %s1877_s15 = smov %s1536_s29  ;;  %16 = sbr.rel (!%p14_p6) target bundleno = 4 (0x4), region = 81 }
 0x363   :  { %969 = vsyncpa [#allocation3], 1 }
 0x364   :  { %971 = vsyncpa [#allocation3 + $0x1], 1 }
 0x365   :  { %972 = vsyncpa [#allocation5], 1 }

</bundles_post_ra>
